<compile_context>
chip_gen: v7x
topology: tpu7x:2x2x1
jax: 0.10.0
libtpu: 0.0.40
codegen_flags: <defaults>
</compile_context>

<pallas_src>
import functools

import jax
import jax.numpy as jnp
from jax import lax
from jax.experimental import pallas as pl
from jax.experimental.pallas import tpu as pltpu


# "Infinity" for masking: far larger than any realistic half-squared-distance term,
# small enough that sums / doublings of it stay finite in f32 (no NaN from inf-inf).
_BIG = 1.0e30


def _round_up(x, m):
    return (x + m - 1) // m * m


def _vmem_budget_bytes():
    """~3/4 of physical VMEM: ~96 MiB on v5e/v6e (128 MiB), ~48 MiB on v7x (64 MiB)."""
    try:
        cap = int(pltpu.get_tpu_info().vmem_capacity_bytes)
    except Exception:
        cap = 64 * 1024 * 1024
    return (cap * 3) // 4


# ----------------------------------------------------------------------------------
# Resident-candidate kernel: 1-D "parallel" grid over anchor-row tiles, full candidate
# matrix resident in VMEM.  Used when it fits the per-generation VMEM budget.
# ----------------------------------------------------------------------------------
def _resident_kernel(margin, tm,
                     x_ref, hsq_r_ref, hsq_c_ref, t_r_ref, t_c_ref, o_ref):
    # Anchor rows: tile-aligned view into the resident candidate matrix
    # (no second HBM stream for x).
    row0 = pl.multiple_of(pl.program_id(0) * tm, tm)
    x_rows = x_ref[pl.ds(row0, tm), :]                                 # (tm, d_pad)

    # Transpose-free gram on the MXU: contract the feature axis of both operands.
    gram = lax.dot_general(x_rows, x_ref[...],
                           dimension_numbers=(((1,), (1,)), ((), ())),
                           preferred_element_type=jnp.float32)          # (tm, n_pad)

    # Mine on half_ij = ||x_j||^2/2 - <x_i, x_j>.  d2_ij = 2*(||x_i||^2/2 + half_ij),
    # and the row term / 2x / sqrt are monotone, so max/min commute with them.
    half = hsq_c_ref[...] - gram                                        # (tm, n_pad)

    # Padded columns: label = max(label)+1 (never matches a real row) and
    # hsq = +_BIG (never wins the negative min) -> no explicit validity mask needed.
    same = t_r_ref[...] == t_c_ref[...]                                 # (tm, n_pad)

    m_ap = jnp.max(jnp.where(same, half, -_BIG), axis=1, keepdims=True)
    m_an = jnp.min(jnp.where(same, _BIG, half), axis=1, keepdims=True)

    hsq_rows = hsq_r_ref[...]
    d2_ap = 2.0 * (m_ap + hsq_rows)
    d2_an = 2.0 * (m_an + hsq_rows)

    # sqrt (EUP) only on the selected (tm, 1) values; clamp matches torch's 1e-12.
    dist_ap = jnp.sqrt(jnp.maximum(d2_ap, 1e-12))
    dist_an = jnp.sqrt(jnp.maximum(d2_an, 1e-12))

    # Per-row MarginRankingLoss(dist_an, dist_ap, y=1); mean is done in the wrapper.
    o_ref[...] = jnp.maximum(dist_ap - dist_an + margin, 0.0)


def _call_resident(x, hsq_rows, hsq_cols, t_rows, t_cols, *, margin, tm,
                   vmem_limit, single_buffer_resident):
    n_pad, d_pad = x.shape
    res_kw = {"pipeline_mode": pl.Buffered(1)} if single_buffer_resident else {}
    kernel = functools.partial(_resident_kernel, float(margin), tm)
    return pl.pallas_call(
        kernel,
        out_shape=jax.ShapeDtypeStruct((n_pad, 1), jnp.float32),
        grid_spec=pltpu.PrefetchScalarGridSpec(
            num_scalar_prefetch=0,
            grid=(n_pad // tm,),
            in_specs=[
                # Constant block index -> resident; single-buffered when supported.
                pl.BlockSpec((n_pad, d_pad), lambda i: (0, 0), **res_kw),  # all rows
                pl.BlockSpec((tm, 1), lambda i: (i, 0)),                   # hsq (rows)
                pl.BlockSpec((1, n_pad), lambda i: (0, 0), **res_kw),      # hsq (cols)
                pl.BlockSpec((tm, 1), lambda i: (i, 0)),                   # labels (rows)
                pl.BlockSpec((1, n_pad), lambda i: (0, 0), **res_kw),      # labels (cols)
            ],
            out_specs=pl.BlockSpec((tm, 1), lambda i: (i, 0)),
        ),
        compiler_params=pltpu.CompilerParams(
            dimension_semantics=("parallel",),
            vmem_limit_bytes=vmem_limit,
        ),
    )(x, hsq_rows, hsq_cols, t_rows, t_cols)


# ----------------------------------------------------------------------------------
# Streaming kernel: 2-D grid ("parallel" anchor-row tiles x "arbitrary" candidate
# column tiles) with running max-positive / min-negative accumulators in VMEM scratch.
# Bounds VMEM independent of n (needed on v7x's 64 MiB for large batches).
# ----------------------------------------------------------------------------------
def _streaming_kernel(margin,
                      xr_ref, xc_ref, hsq_r_ref, hsq_c_ref, t_r_ref, t_c_ref,
                      o_ref, m_ap_ref, m_an_ref):
    j = pl.program_id(1)

    @pl.when(j == 0)
    def _():
        m_ap_ref[...] = jnp.full_like(m_ap_ref, -_BIG)
        m_an_ref[...] = jnp.full_like(m_an_ref, _BIG)

    gram = lax.dot_general(xr_ref[...], xc_ref[...],
                           dimension_numbers=(((1,), (1,)), ((), ())),
                           preferred_element_type=jnp.float32)          # (tm, tn)
    half = hsq_c_ref[...] - gram
    same = t_r_ref[...] == t_c_ref[...]

    m_ap_ref[...] = jnp.maximum(
        m_ap_ref[...], jnp.max(jnp.where(same, half, -_BIG), axis=1, keepdims=True))
    m_an_ref[...] = jnp.minimum(
        m_an_ref[...], jnp.min(jnp.where(same, _BIG, half), axis=1, keepdims=True))

    @pl.when(j == pl.num_programs(1) - 1)
    def _():
        hsq_rows = hsq_r_ref[...]
        d2_ap = 2.0 * (m_ap_ref[...] + hsq_rows)
        d2_an = 2.0 * (m_an_ref[...] + hsq_rows)
        dist_ap = jnp.sqrt(jnp.maximum(d2_ap, 1e-12))
        dist_an = jnp.sqrt(jnp.maximum(d2_an, 1e-12))
        o_ref[...] = jnp.maximum(dist_ap - dist_an + margin, 0.0)


def _call_streaming(x, hsq_rows, hsq_cols, t_rows, t_cols, *, margin, tm, tn,
                    vmem_limit):
    n_pad, d_pad = x.shape
    kernel = functools.partial(_streaming_kernel, float(margin))
    return pl.pallas_call(
        kernel,
        out_shape=jax.ShapeDtypeStruct((n_pad, 1), jnp.float32),
        grid_spec=pltpu.PrefetchScalarGridSpec(
            num_scalar_prefetch=0,
            grid=(n_pad // tm, n_pad // tn),
            in_specs=[
                pl.BlockSpec((tm, d_pad), lambda i, j: (i, 0)),   # anchor rows
                pl.BlockSpec((tn, d_pad), lambda i, j: (j, 0)),   # candidate block
                pl.BlockSpec((tm, 1), lambda i, j: (i, 0)),       # hsq (rows)
                pl.BlockSpec((1, tn), lambda i, j: (0, j)),       # hsq (cols)
                pl.BlockSpec((tm, 1), lambda i, j: (i, 0)),       # labels (rows)
                pl.BlockSpec((1, tn), lambda i, j: (0, j)),       # labels (cols)
            ],
            out_specs=pl.BlockSpec((tm, 1), lambda i, j: (i, 0)),
            scratch_shapes=[pltpu.VMEM((tm, 1), jnp.float32),     # running max (pos)
                            pltpu.VMEM((tm, 1), jnp.float32)],    # running min (neg)
        ),
        compiler_params=pltpu.CompilerParams(
            dimension_semantics=("parallel", "arbitrary"),
            vmem_limit_bytes=vmem_limit,
        ),
    )(x, x, hsq_rows, hsq_cols, t_rows, t_cols)


# ----------------------------------------------------------------------------------
# Wrapper
# ----------------------------------------------------------------------------------
def hard_triplet_loss(inputs, targets, margin=0.3, *, compute_in_bf16=False,
                      force_streaming=False):
    """inputs: (n, d) float array, targets: (n,) int labels -> scalar loss."""
    n, d = inputs.shape

    x = inputs
    if compute_in_bf16 and x.dtype == jnp.float32:
        # bf16-native MXU (~3-6x faster matmul); f32 accumulation.  Hard-pair
        # selection can flip on near-ties relative to the pure f32 path.
        x = x.astype(jnp.bfloat16)

    d_pad = _round_up(d, 128)
    budget = _vmem_budget_bytes()

    # Row tile: multiple of 8 sublanes; guarantee >=2 "parallel" row tiles whenever
    # possible so v7x's second TensorCore is not idle.
    n8 = _round_up(max(n, 1), 8)
    tm_res = 256 if n8 >= 512 else max(8, _round_up(max(n8 // 2, 1), 8))
    n_pad_res = _round_up(n, tm_res)

    itemsize = x.dtype.itemsize
    resident_est = (n_pad_res * d_pad * itemsize        # resident candidate matrix
                    + 6 * tm_res * n_pad_res * 4        # live (tm, n_pad) f32 temporaries
                    + 2 * tm_res * d_pad * itemsize     # slack / possible double-buffer
                    + (2 << 20))
    use_streaming = force_streaming or resident_est > budget

    if use_streaming:
        tm = 128
        tn = 128 if n <= 1024 else 1024
        n_pad = _round_up(n, max(tm, tn))
    else:
        tm = tm_res
        n_pad = n_pad_res

    if (n_pad, d_pad) != (n, d):
        xp = jnp.zeros((n_pad, d_pad), dtype=x.dtype).at[:n, :d].set(x)
    else:
        xp = x

    # Half squared row norms (f32), computed once outside the kernel from the same
    # operand that feeds the MXU.  Padded slots carry +_BIG so a padded column can
    # never win the hard-negative min (the 2x is folded into the kernel epilogue).
    hsq = 0.5 * jnp.sum(x.astype(jnp.float32) ** 2, axis=1)
    hsq = jnp.full((n_pad,), _BIG, dtype=jnp.float32).at[:n].set(hsq)
    hsq_rows = hsq.reshape(n_pad, 1)
    hsq_cols = hsq.reshape(1, n_pad)

    # Labels padded with max(label)+1: provably outside the real label range, so a
    # padded column never enters any real row's positive set (no in-kernel iota mask).
    t = targets.astype(jnp.int32)
    tpad = jnp.full((n_pad,), jnp.max(t) + 1, dtype=jnp.int32).at[:n].set(t)
    t_rows = tpad.reshape(n_pad, 1)
    t_cols = tpad.reshape(1, n_pad)

    if use_streaming:
        per_row = _call_streaming(xp, hsq_rows, hsq_cols, t_rows, t_cols,
                                  margin=margin, tm=tm, tn=tn, vmem_limit=budget)
    else:
        try:
            per_row = _call_resident(xp, hsq_rows, hsq_cols, t_rows, t_cols,
                                     margin=margin, tm=tm, vmem_limit=budget,
                                     single_buffer_resident=True)
        except Exception:
            # Fallback if pipeline_mode=pl.Buffered(1) is not supported by this
            # jax version: identical kernel, default double buffering.
            per_row = _call_resident(xp, hsq_rows, hsq_cols, t_rows, t_cols,
                                     margin=margin, tm=tm, vmem_limit=budget,
                                     single_buffer_resident=False)

    # Padded anchor rows produce finite garbage; slice them off before the mean.
    return jnp.mean(per_row[:n, 0])


def _reference_loss(inputs, targets, margin):
    """Pure-JAX reference (same math as the PyTorch module)."""
    x = inputs.astype(jnp.float32)
    sq = jnp.sum(x ** 2, axis=1, keepdims=True)
    d2 = sq + sq.T - 2.0 * x @ x.T
    dist = jnp.sqrt(jnp.maximum(d2, 1e-12))
    mask = targets[:, None] == targets[None, :]
    d_ap = jnp.max(jnp.where(mask, dist, -jnp.inf), axis=1)
    d_an = jnp.min(jnp.where(mask, jnp.inf, dist), axis=1)
    return jnp.mean(jnp.maximum(d_ap - d_an + margin, 0.0))


if __name__ == "__main__":
    key = jax.random.PRNGKey(0)
    k1, k2, k3 = jax.random.split(key, 3)

    # Case 1: batch of 8 embeddings, feature dim 32 (4 classes x 2 samples).
    x1 = jax.random.normal(k1, (8, 32), dtype=jnp.float32)
    t1 = jnp.array([0, 0, 1, 1, 2, 2, 3, 3], dtype=jnp.int32)
    loss1 = hard_triplet_loss(x1, t1, margin=0.3)
    jax.block_until_ready(loss1)
    ref1 = _reference_loss(x1, t1, 0.3)
    assert jnp.allclose(loss1, ref1, rtol=1e-5, atol=1e-5), (loss1, ref1)

    # Case 2: batch / feat_dim not multiples of the tiles -> padding + sentinel path.
    x2 = jax.random.normal(k2, (6, 20), dtype=jnp.float32)
    t2 = jnp.array([0, 0, 1, 1, 2, 2], dtype=jnp.int32)
    loss2 = hard_triplet_loss(x2, t2, margin=0.3)
    jax.block_until_ready(loss2)
    ref2 = _reference_loss(x2, t2, 0.3)
    assert jnp.allclose(loss2, ref2, rtol=1e-5, atol=1e-5), (loss2, ref2)

    # Case 3: streaming (candidate-column-tiled) path with running accumulators,
    # 2x2 grid, padded candidate columns in the last tile.
    x3 = jax.random.normal(k3, (160, 96), dtype=jnp.float32)
    t3 = jnp.repeat(jnp.arange(20, dtype=jnp.int32), 8)
    loss3 = hard_triplet_loss(x3, t3, margin=0.3, force_streaming=True)
    jax.block_until_ready(loss3)
    ref3 = _reference_loss(x3, t3, 0.3)
    assert jnp.allclose(loss3, ref3, rtol=1e-4, atol=1e-4), (loss3, ref3)

    # Case 4: bf16 gram operands on the resident path, compared against the
    # bf16-quantized f32 reference (mining is discrete; only near-ties can differ).
    loss4 = hard_triplet_loss(x3, t3, margin=0.3, compute_in_bf16=True)
    jax.block_until_ready(loss4)
    ref4 = _reference_loss(x3.astype(jnp.bfloat16).astype(jnp.float32), t3, 0.3)
    assert jnp.allclose(loss4, ref4, rtol=5e-2, atol=5e-2), (loss4, ref4)

    print("KERNEL_OK")
</pallas_src>

<mosaic_0001>
module attributes {stable_mosaic.version = 11 : i64} {
  func.func @_resident_kernel(%arg0: i32, %arg1: memref<8x128xf32, #tpu.memory_space<vmem>>, %arg2: memref<8x1xf32, #tpu.memory_space<vmem>>, %arg3: memref<1x8xf32, #tpu.memory_space<vmem>>, %arg4: memref<8x1xi32, #tpu.memory_space<vmem>>, %arg5: memref<1x8xi32, #tpu.memory_space<vmem>>, %arg6: memref<8x1xf32, #tpu.memory_space<vmem>>) attributes {dimension_semantics = [#tpu.dimension_semantics<parallel>], iteration_bounds = array<i64: 1>, scalar_prefetch = 0 : i64, scratch_operands = 0 : i64, tpu.core_type = #tpu.core_type<tc>, window_params = [{pipeline_mode = #tpu.pipeline_mode<synchronous>, transform_indices = @transform_0, window_bounds = array<i64: 8, 128>}, {transform_indices = @transform_1, window_bounds = array<i64: 8, 1>}, {pipeline_mode = #tpu.pipeline_mode<synchronous>, transform_indices = @transform_2, window_bounds = array<i64: 1, 8>}, {transform_indices = @transform_3, window_bounds = array<i64: 8, 1>}, {pipeline_mode = #tpu.pipeline_mode<synchronous>, transform_indices = @transform_4, window_bounds = array<i64: 1, 8>}, {transform_indices = @transform_5, window_bounds = array<i64: 8, 1>}]} {
    %c8_i32 = arith.constant 8 : i32
    %0 = arith.muli %arg0, %c8_i32 : i32
    %1 = tpu.assume_multiple %0, 8 : i32
    %2 = arith.index_cast %1 : i32 to index
    %c0 = arith.constant 0 : index
    %3 = vector.load %arg1[%2, %c0] : memref<8x128xf32, #tpu.memory_space<vmem>>, vector<8x128xf32>
    %c0_0 = arith.constant 0 : index
    %c0_1 = arith.constant 0 : index
    %4 = vector.load %arg1[%c0_0, %c0_1] : memref<8x128xf32, #tpu.memory_space<vmem>>, vector<8x128xf32>
    %cst = arith.constant dense<0.000000e+00> : vector<8x8xf32>
    %5 = tpu.matmul %3, %4, %cst {dimension_numbers = #tpu.dot_dimension_numbers<[1], [1], [0], [0], [0, 0, 1, 0], [], []>} : vector<8x128xf32>, vector<8x128xf32>, vector<8x8xf32> -> vector<8x8xf32>
    %c0_2 = arith.constant 0 : index
    %c0_3 = arith.constant 0 : index
    %6 = vector.load %arg3[%c0_2, %c0_3] : memref<1x8xf32, #tpu.memory_space<vmem>>, vector<1x8xf32>
    %7 = vector.broadcast %6 : vector<1x8xf32> to vector<8x8xf32>
    %8 = arith.subf %7, %5 : vector<8x8xf32>
    %c0_4 = arith.constant 0 : index
    %c0_5 = arith.constant 0 : index
    %9 = vector.load %arg4[%c0_4, %c0_5] : memref<8x1xi32, #tpu.memory_space<vmem>>, vector<8x1xi32>
    %c0_6 = arith.constant 0 : index
    %c0_7 = arith.constant 0 : index
    %10 = vector.load %arg5[%c0_6, %c0_7] : memref<1x8xi32, #tpu.memory_space<vmem>>, vector<1x8xi32>
    %11 = vector.broadcast %9 : vector<8x1xi32> to vector<8x8xi32>
    %12 = vector.broadcast %10 : vector<1x8xi32> to vector<8x8xi32>
    %13 = arith.cmpi eq, %11, %12 : vector<8x8xi32>
    %cst_8 = arith.constant -1.000000e+30 : f32
    %14 = vector.broadcast %cst_8 : f32 to vector<8x8xf32>
    %15 = arith.select %13, %8, %14 : vector<8x8xi1>, vector<8x8xf32>
    %cst_9 = arith.constant dense<0xFF800000> : vector<8xf32>
    %16 = vector.multi_reduction <maximumf>, %15, %cst_9 [1] : vector<8x8xf32> to vector<8xf32>
    %17 = vector.shape_cast %16 : vector<8xf32> to vector<8x1xf32>
    %cst_10 = arith.constant 1.000000e+30 : f32
    %18 = vector.broadcast %cst_10 : f32 to vector<8x8xf32>
    %19 = arith.select %13, %18, %8 : vector<8x8xi1>, vector<8x8xf32>
    %cst_11 = arith.constant dense<0x7F800000> : vector<8xf32>
    %20 = vector.multi_reduction <minimumf>, %19, %cst_11 [1] : vector<8x8xf32> to vector<8xf32>
    %21 = vector.shape_cast %20 : vector<8xf32> to vector<8x1xf32>
    %c0_12 = arith.constant 0 : index
    %c0_13 = arith.constant 0 : index
    %22 = vector.load %arg2[%c0_12, %c0_13] : memref<8x1xf32, #tpu.memory_space<vmem>>, vector<8x1xf32>
    %23 = arith.addf %17, %22 : vector<8x1xf32>
    %cst_14 = arith.constant 2.000000e+00 : f32
    %24 = vector.broadcast %cst_14 : f32 to vector<8x1xf32>
    %25 = arith.mulf %24, %23 : vector<8x1xf32>
    %26 = arith.addf %21, %22 : vector<8x1xf32>
    %cst_15 = arith.constant 2.000000e+00 : f32
    %27 = vector.broadcast %cst_15 : f32 to vector<8x1xf32>
    %28 = arith.mulf %27, %26 : vector<8x1xf32>
    %cst_16 = arith.constant 9.99999996E-13 : f32
    %29 = vector.broadcast %cst_16 : f32 to vector<8x1xf32>
    %30 = arith.maximumf %25, %29 : vector<8x1xf32>
    %31 = math.sqrt %30 : vector<8x1xf32>
    %cst_17 = arith.constant 9.99999996E-13 : f32
    %32 = vector.broadcast %cst_17 : f32 to vector<8x1xf32>
    %33 = arith.maximumf %28, %32 : vector<8x1xf32>
    %34 = math.sqrt %33 : vector<8x1xf32>
    %35 = arith.subf %31, %34 : vector<8x1xf32>
    %cst_18 = arith.constant 3.000000e-01 : f32
    %36 = vector.broadcast %cst_18 : f32 to vector<8x1xf32>
    %37 = arith.addf %35, %36 : vector<8x1xf32>
    %cst_19 = arith.constant 0.000000e+00 : f32
    %38 = vector.broadcast %cst_19 : f32 to vector<8x1xf32>
    %39 = arith.maximumf %37, %38 : vector<8x1xf32>
    %c0_20 = arith.constant 0 : index
    %c0_21 = arith.constant 0 : index
    %40 = vector.load %arg6[%c0_20, %c0_21] : memref<8x1xf32, #tpu.memory_space<vmem>>, vector<8x1xf32>
    tpu.vector_store %arg6[%c0_20, %c0_21], %39 {strides = array<i32>} : memref<8x1xf32, #tpu.memory_space<vmem>>, vector<8x1xf32>,
    return
  }
  func.func @transform_0(%arg0: i32) -> (i32, i32) {
    %c0_i32 = arith.constant 0 : i32
    %c0_i32_0 = arith.constant 0 : i32
    %c0_i32_1 = arith.constant 0 : i32
    return %c0_i32, %c0_i32_0 : i32, i32
  }
  func.func @transform_1(%arg0: i32) -> (i32, i32) {
    %c0_i32 = arith.constant 0 : i32
    %c0_i32_0 = arith.constant 0 : i32
    return %arg0, %c0_i32 : i32, i32
  }
  func.func @transform_2(%arg0: i32) -> (i32, i32) {
    %c0_i32 = arith.constant 0 : i32
    %c0_i32_0 = arith.constant 0 : i32
    %c0_i32_1 = arith.constant 0 : i32
    return %c0_i32, %c0_i32_0 : i32, i32
  }
  func.func @transform_3(%arg0: i32) -> (i32, i32) {
    %c0_i32 = arith.constant 0 : i32
    %c0_i32_0 = arith.constant 0 : i32
    return %arg0, %c0_i32 : i32, i32
  }
  func.func @transform_4(%arg0: i32) -> (i32, i32) {
    %c0_i32 = arith.constant 0 : i32
    %c0_i32_0 = arith.constant 0 : i32
    %c0_i32_1 = arith.constant 0 : i32
    return %c0_i32, %c0_i32_0 : i32, i32
  }
  func.func @transform_5(%arg0: i32) -> (i32, i32) {
    %c0_i32 = arith.constant 0 : i32
    %c0_i32_0 = arith.constant 0 : i32
    return %arg0, %c0_i32 : i32, i32
  }
}

module attributes {stable_mosaic.version = 11 : i64} {
  func.func @_resident_kernel(%arg0: i32, %arg1: memref<8x128xf32, #tpu.memory_space<vmem>>, %arg2: memref<8x1xf32, #tpu.memory_space<vmem>>, %arg3: memref<1x8xf32, #tpu.memory_space<vmem>>, %arg4: memref<8x1xi32, #tpu.memory_space<vmem>>, %arg5: memref<1x8xi32, #tpu.memory_space<vmem>>, %arg6: memref<8x1xf32, #tpu.memory_space<vmem>>) attributes {dimension_semantics = [#tpu.dimension_semantics<parallel>], iteration_bounds = array<i64: 1>, scalar_prefetch = 0 : i64, scratch_operands = 0 : i64, tpu.core_type = #tpu.core_type<tc>, window_params = [{pipeline_mode = #tpu.pipeline_mode<synchronous>, transform_indices = @transform_0, window_bounds = array<i64: 8, 128>}, {transform_indices = @transform_1, window_bounds = array<i64: 8, 1>}, {pipeline_mode = #tpu.pipeline_mode<synchronous>, transform_indices = @transform_2, window_bounds = array<i64: 1, 8>}, {transform_indices = @transform_3, window_bounds = array<i64: 8, 1>}, {pipeline_mode = #tpu.pipeline_mode<synchronous>, transform_indices = @transform_4, window_bounds = array<i64: 1, 8>}, {transform_indices = @transform_5, window_bounds = array<i64: 8, 1>}]} {
    %c8_i32 = arith.constant 8 : i32
    %0 = arith.muli %arg0, %c8_i32 : i32
    %1 = tpu.assume_multiple %0, 8 : i32
    %2 = arith.index_cast %1 : i32 to index
    %c0 = arith.constant 0 : index
    %3 = vector.load %arg1[%2, %c0] : memref<8x128xf32, #tpu.memory_space<vmem>>, vector<8x128xf32>
    %c0_0 = arith.constant 0 : index
    %c0_1 = arith.constant 0 : index
    %4 = vector.load %arg1[%c0_0, %c0_1] : memref<8x128xf32, #tpu.memory_space<vmem>>, vector<8x128xf32>
    %cst = arith.constant dense<0.000000e+00> : vector<8x8xf32>
    %5 = tpu.matmul %3, %4, %cst {dimension_numbers = #tpu.dot_dimension_numbers<[1], [1], [0], [0], [0, 0, 1, 0], [], []>} : vector<8x128xf32>, vector<8x128xf32>, vector<8x8xf32> -> vector<8x8xf32>
    %c0_2 = arith.constant 0 : index
    %c0_3 = arith.constant 0 : index
    %6 = vector.load %arg3[%c0_2, %c0_3] : memref<1x8xf32, #tpu.memory_space<vmem>>, vector<1x8xf32>
    %7 = vector.broadcast %6 : vector<1x8xf32> to vector<8x8xf32>
    %8 = arith.subf %7, %5 : vector<8x8xf32>
    %c0_4 = arith.constant 0 : index
    %c0_5 = arith.constant 0 : index
    %9 = vector.load %arg4[%c0_4, %c0_5] : memref<8x1xi32, #tpu.memory_space<vmem>>, vector<8x1xi32>
    %c0_6 = arith.constant 0 : index
    %c0_7 = arith.constant 0 : index
    %10 = vector.load %arg5[%c0_6, %c0_7] : memref<1x8xi32, #tpu.memory_space<vmem>>, vector<1x8xi32>
    %11 = vector.broadcast %9 : vector<8x1xi32> to vector<8x8xi32>
    %12 = vector.broadcast %10 : vector<1x8xi32> to vector<8x8xi32>
    %13 = arith.cmpi eq, %11, %12 : vector<8x8xi32>
    %cst_8 = arith.constant -1.000000e+30 : f32
    %14 = vector.broadcast %cst_8 : f32 to vector<8x8xf32>
    %15 = arith.select %13, %8, %14 : vector<8x8xi1>, vector<8x8xf32>
    %cst_9 = arith.constant dense<0xFF800000> : vector<8xf32>
    %16 = vector.multi_reduction <maximumf>, %15, %cst_9 [1] : vector<8x8xf32> to vector<8xf32>
    %17 = vector.shape_cast %16 : vector<8xf32> to vector<8x1xf32>
    %cst_10 = arith.constant 1.000000e+30 : f32
    %18 = vector.broadcast %cst_10 : f32 to vector<8x8xf32>
    %19 = arith.select %13, %18, %8 : vector<8x8xi1>, vector<8x8xf32>
    %cst_11 = arith.constant dense<0x7F800000> : vector<8xf32>
    %20 = vector.multi_reduction <minimumf>, %19, %cst_11 [1] : vector<8x8xf32> to vector<8xf32>
    %21 = vector.shape_cast %20 : vector<8xf32> to vector<8x1xf32>
    %c0_12 = arith.constant 0 : index
    %c0_13 = arith.constant 0 : index
    %22 = vector.load %arg2[%c0_12, %c0_13] : memref<8x1xf32, #tpu.memory_space<vmem>>, vector<8x1xf32>
    %23 = arith.addf %17, %22 : vector<8x1xf32>
    %cst_14 = arith.constant 2.000000e+00 : f32
    %24 = vector.broadcast %cst_14 : f32 to vector<8x1xf32>
    %25 = arith.mulf %24, %23 : vector<8x1xf32>
    %26 = arith.addf %21, %22 : vector<8x1xf32>
    %cst_15 = arith.constant 2.000000e+00 : f32
    %27 = vector.broadcast %cst_15 : f32 to vector<8x1xf32>
    %28 = arith.mulf %27, %26 : vector<8x1xf32>
    %cst_16 = arith.constant 9.99999996E-13 : f32
    %29 = vector.broadcast %cst_16 : f32 to vector<8x1xf32>
    %30 = arith.maximumf %25, %29 : vector<8x1xf32>
    %31 = math.sqrt %30 : vector<8x1xf32>
    %cst_17 = arith.constant 9.99999996E-13 : f32
    %32 = vector.broadcast %cst_17 : f32 to vector<8x1xf32>
    %33 = arith.maximumf %28, %32 : vector<8x1xf32>
    %34 = math.sqrt %33 : vector<8x1xf32>
    %35 = arith.subf %31, %34 : vector<8x1xf32>
    %cst_18 = arith.constant 3.000000e-01 : f32
    %36 = vector.broadcast %cst_18 : f32 to vector<8x1xf32>
    %37 = arith.addf %35, %36 : vector<8x1xf32>
    %cst_19 = arith.constant 0.000000e+00 : f32
    %38 = vector.broadcast %cst_19 : f32 to vector<8x1xf32>
    %39 = arith.maximumf %37, %38 : vector<8x1xf32>
    %c0_20 = arith.constant 0 : index
    %c0_21 = arith.constant 0 : index
    %40 = vector.load %arg6[%c0_20, %c0_21] : memref<8x1xf32, #tpu.memory_space<vmem>>, vector<8x1xf32>
    tpu.vector_store %arg6[%c0_20, %c0_21], %39 {strides = array<i32>} : memref<8x1xf32, #tpu.memory_space<vmem>>, vector<8x1xf32>,
    return
  }
  func.func @transform_0(%arg0: i32) -> (i32, i32) {
    %c0_i32 = arith.constant 0 : i32
    %c0_i32_0 = arith.constant 0 : i32
    %c0_i32_1 = arith.constant 0 : i32
    return %c0_i32, %c0_i32_0 : i32, i32
  }
  func.func @transform_1(%arg0: i32) -> (i32, i32) {
    %c0_i32 = arith.constant 0 : i32
    %c0_i32_0 = arith.constant 0 : i32
    return %arg0, %c0_i32 : i32, i32
  }
  func.func @transform_2(%arg0: i32) -> (i32, i32) {
    %c0_i32 = arith.constant 0 : i32
    %c0_i32_0 = arith.constant 0 : i32
    %c0_i32_1 = arith.constant 0 : i32
    return %c0_i32, %c0_i32_0 : i32, i32
  }
  func.func @transform_3(%arg0: i32) -> (i32, i32) {
    %c0_i32 = arith.constant 0 : i32
    %c0_i32_0 = arith.constant 0 : i32
    return %arg0, %c0_i32 : i32, i32
  }
  func.func @transform_4(%arg0: i32) -> (i32, i32) {
    %c0_i32 = arith.constant 0 : i32
    %c0_i32_0 = arith.constant 0 : i32
    %c0_i32_1 = arith.constant 0 : i32
    return %c0_i32, %c0_i32_0 : i32, i32
  }
  func.func @transform_5(%arg0: i32) -> (i32, i32) {
    %c0_i32 = arith.constant 0 : i32
    %c0_i32_0 = arith.constant 0 : i32
    return %arg0, %c0_i32 : i32, i32
  }
}

</mosaic_0001>

<bundles_post_ra>
// kernel: tpu_custom_call.1
= control target key start
LH: loop header
LB: loop body
LE: loop exit
PB: predicated region body
PF: predicated region fallthrough
CT: control target
= control target key end

     0   :  { %v168_v0 = vmov 0.0   ;;  %vm169_vm0 = vmmov 0   ;;  %v170_v3 = vmov 0   ;;  %vm113_vm2 = vcmask 64512   ;;  %s219_s0 = inlined_call_operand.vmem [shape: f32[8,128], index: 0, kind: input, shape index: {}]   ;;  %s220_s3 = inlined_call_operand.vmem [shape: s32[8,1], index: 3, kind: input, shape index: {}]   ;;  %s221_s4 = inlined_call_operand.vmem [shape: s32[1,8], index: 4, kind: input, shape index: {}]   ;;  %s222_s2 = inlined_call_operand.vmem [shape: f32[1,8], index: 2, kind: input, shape index: {}]   ;;  %s223_s1 = inlined_call_operand.vmem [shape: f32[8,1], index: 1, kind: input, shape index: {}]   ;;  %s224_s5 = inlined_call_operand.vmem [shape: f32[8,1], index: 5, kind: output, shape index: {}]  }
   0x1   :  { %155 = vmatprep.subr.mxu0 %v168_v0  ;;  %v23_v1 = vld [vmem:[%s219_s0] sm:$0xff]  ;;  %157 = vmatprep.mubr.msk.f32.mxu0 %vm169_vm0, %v168_v0  ;;  %vm145_vm7 = vcmask 7168  }
   0x2   :  { %v102_v2 = vld [vmem:[%s220_s3] sm:$0xff]  ;;  %156 = vmatpush3.xpose.msra.mxu0 %v23_v1  ;;  %163 = vset.pattern.permute.xlu0 %v170_v3 }
   0x3   :  { %105 = vperm.xlu0 %163, %v102_v2   ;;  %v152_v4 = vld [vmem:[%s221_s4] ss:$0 sm:$0xff] }
   0x4   :  { %v151_v6 = vld [vmem:[%s222_s2] ss:$0 sm:$0xff] }
   0x5   :  { %158 = vmatmul.mubr.f32.vlgmr.msra.gmra.mrb[0].mxu0 %v23_v1  ;;  %v121_v14 = vld [vmem:[%s223_s1] sm:$0xff] }
  0x82   :  { %v106_v5 = vpop.permute.xlu0 %105 }
  0x83   :  { %vm111_vm1 = vcmp.eq.s32.totalorder %v106_v5, %v152_v4 }
  0xd8   :  { %v90_v7 = vpop.f32.mrb[0].mxu0 }
  0xd9   :  { %v101_v8 = vsub.f32 %v151_v6, %v90_v7  ;;  %v159_v9 = vpop.f32.mrb[1].mxu0 }
  0xdb   :  { %v117_v10 = vsel %vm111_vm1, 1e+30, %v101_v8  ;;  %v112_v11 = vsel %vm111_vm1, %v101_v8, -1e+30 }
  0xdc   :  { %v118_v12 = vsel %vm113_vm2, %v117_v10, inf  ;;  %v114_v13 = vsel %vm113_vm2, %v112_v11, -inf }
  0xdd   :  { %119 = vmin.xlane.f32.xlu1 %v118_v12  ;;  %115 = vmax.xlane.f32.xlu0 %v114_v13 }
 0x16a   :  { %v120_v15 = vpop.xlane.xlu1 %119  ;;  %v116_v16 = vpop.xlane.xlu0 %115 }
 0x16b   :  { %v124_v17 = vadd.f32 %v121_v14, %v120_v15  ;;  %v122_v18 = vadd.f32 %v121_v14, %v116_v16 }
 0x16d   :  { %v125_v19 = vmul.f32 2.0, %v124_v17  ;;  %v123_v20 = vmul.f32 2.0, %v122_v18 }
 0x16f   :  { %v134_v21 = vmax.f32 %v125_v19, 1e-12  ;;  %v126_v22 = vmax.f32 %v123_v20, 1e-12 }
 0x171   :  { %164 = vrsqrt.f32 %v134_v21  ;;  %vm137_vm3 = vcmp.eq.f32.partialorder %v134_v21, inf  ;;  %v140_v26 = vand.u32 2147483648, %v134_v21  ;;  %vm139_vm4 = vcmp.eq.f32.partialorder %v134_v21, 0.0 }
 0x172   :  { %166 = vrsqrt.f32 %v126_v22  ;;  %vm129_vm5 = vcmp.eq.f32.partialorder %v126_v22, inf  ;;  %v132_v29 = vand.u32 2147483648, %v126_v22  ;;  %vm131_vm6 = vcmp.eq.f32.partialorder %v126_v22, 0.0 }
 0x17b   :  { %v165_v23 = vpop.eup %164 }
 0x17c   :  { %v167_v24 = vpop.eup %166  ;;  %v136_v25 = vmul.f32 %v165_v23, %v134_v21 }
 0x17d   :  { %v128_v27 = vmul.f32 %v167_v24, %v126_v22 }
 0x17e   :  { %v138_v28 = vsel %vm137_vm3, %v134_v21, %v136_v25 }
 0x17f   :  { %v141_v30 = vsel %vm139_vm4, %v140_v26, %v138_v28  ;;  %v130_v31 = vsel %vm129_vm5, %v126_v22, %v128_v27 }
 0x180   :  { %v133_v32 = vsel %vm131_vm6, %v132_v29, %v130_v31 }
 0x181   :  { %v142_v33 = vsub.f32 %v133_v32, %v141_v30 }
 0x183   :  { %v143_v34 = vadd.f32 0.3, %v142_v33 }
 0x185   :  { %v144_v35 = vmax.f32 %v143_v34, 0.0 }
 0x187   :  { %146 = vst.msk [vmem:[%s224_s5] sm:$0xff] %vm145_vm7, %v144_v35 }

// kernel: tpu_custom_call.1
= control target key start
LH: loop header
LB: loop body
LE: loop exit
PB: predicated region body
PF: predicated region fallthrough
CT: control target
= control target key end

     0   :  { %v168_v0 = vmov 0.0   ;;  %vm169_vm0 = vmmov 0   ;;  %v170_v3 = vmov 0   ;;  %vm113_vm2 = vcmask 64512   ;;  %s219_s0 = inlined_call_operand.vmem [shape: f32[8,128], index: 0, kind: input, shape index: {}]   ;;  %s220_s3 = inlined_call_operand.vmem [shape: s32[8,1], index: 3, kind: input, shape index: {}]   ;;  %s221_s4 = inlined_call_operand.vmem [shape: s32[1,8], index: 4, kind: input, shape index: {}]   ;;  %s222_s2 = inlined_call_operand.vmem [shape: f32[1,8], index: 2, kind: input, shape index: {}]   ;;  %s223_s1 = inlined_call_operand.vmem [shape: f32[8,1], index: 1, kind: input, shape index: {}]   ;;  %s224_s5 = inlined_call_operand.vmem [shape: f32[8,1], index: 5, kind: output, shape index: {}]  }
   0x1   :  { %155 = vmatprep.subr.mxu0 %v168_v0  ;;  %v23_v1 = vld [vmem:[%s219_s0] sm:$0xff]  ;;  %157 = vmatprep.mubr.msk.f32.mxu0 %vm169_vm0, %v168_v0  ;;  %vm145_vm7 = vcmask 7168  }
   0x2   :  { %v102_v2 = vld [vmem:[%s220_s3] sm:$0xff]  ;;  %156 = vmatpush3.xpose.msra.mxu0 %v23_v1  ;;  %163 = vset.pattern.permute.xlu0 %v170_v3 }
   0x3   :  { %105 = vperm.xlu0 %163, %v102_v2   ;;  %v152_v4 = vld [vmem:[%s221_s4] ss:$0 sm:$0xff] }
   0x4   :  { %v151_v6 = vld [vmem:[%s222_s2] ss:$0 sm:$0xff] }
   0x5   :  { %158 = vmatmul.mubr.f32.vlgmr.msra.gmra.mrb[0].mxu0 %v23_v1  ;;  %v121_v14 = vld [vmem:[%s223_s1] sm:$0xff] }
  0x82   :  { %v106_v5 = vpop.permute.xlu0 %105 }
  0x83   :  { %vm111_vm1 = vcmp.eq.s32.totalorder %v106_v5, %v152_v4 }
  0xd8   :  { %v90_v7 = vpop.f32.mrb[0].mxu0 }
  0xd9   :  { %v101_v8 = vsub.f32 %v151_v6, %v90_v7  ;;  %v159_v9 = vpop.f32.mrb[1].mxu0 }
  0xdb   :  { %v117_v10 = vsel %vm111_vm1, 1e+30, %v101_v8  ;;  %v112_v11 = vsel %vm111_vm1, %v101_v8, -1e+30 }
  0xdc   :  { %v118_v12 = vsel %vm113_vm2, %v117_v10, inf  ;;  %v114_v13 = vsel %vm113_vm2, %v112_v11, -inf }
  0xdd   :  { %119 = vmin.xlane.f32.xlu1 %v118_v12  ;;  %115 = vmax.xlane.f32.xlu0 %v114_v13 }
 0x16a   :  { %v120_v15 = vpop.xlane.xlu1 %119  ;;  %v116_v16 = vpop.xlane.xlu0 %115 }
 0x16b   :  { %v124_v17 = vadd.f32 %v121_v14, %v120_v15  ;;  %v122_v18 = vadd.f32 %v121_v14, %v116_v16 }
 0x16d   :  { %v125_v19 = vmul.f32 2.0, %v124_v17  ;;  %v123_v20 = vmul.f32 2.0, %v122_v18 }
 0x16f   :  { %v134_v21 = vmax.f32 %v125_v19, 1e-12  ;;  %v126_v22 = vmax.f32 %v123_v20, 1e-12 }
 0x171   :  { %164 = vrsqrt.f32 %v134_v21  ;;  %vm137_vm3 = vcmp.eq.f32.partialorder %v134_v21, inf  ;;  %v140_v26 = vand.u32 2147483648, %v134_v21  ;;  %vm139_vm4 = vcmp.eq.f32.partialorder %v134_v21, 0.0 }
 0x172   :  { %166 = vrsqrt.f32 %v126_v22  ;;  %vm129_vm5 = vcmp.eq.f32.partialorder %v126_v22, inf  ;;  %v132_v29 = vand.u32 2147483648, %v126_v22  ;;  %vm131_vm6 = vcmp.eq.f32.partialorder %v126_v22, 0.0 }
 0x17b   :  { %v165_v23 = vpop.eup %164 }
 0x17c   :  { %v167_v24 = vpop.eup %166  ;;  %v136_v25 = vmul.f32 %v165_v23, %v134_v21 }
 0x17d   :  { %v128_v27 = vmul.f32 %v167_v24, %v126_v22 }
 0x17e   :  { %v138_v28 = vsel %vm137_vm3, %v134_v21, %v136_v25 }
 0x17f   :  { %v141_v30 = vsel %vm139_vm4, %v140_v26, %v138_v28  ;;  %v130_v31 = vsel %vm129_vm5, %v126_v22, %v128_v27 }
 0x180   :  { %v133_v32 = vsel %vm131_vm6, %v132_v29, %v130_v31 }
 0x181   :  { %v142_v33 = vsub.f32 %v133_v32, %v141_v30 }
 0x183   :  { %v143_v34 = vadd.f32 0.3, %v142_v33 }
 0x185   :  { %v144_v35 = vmax.f32 %v143_v34, 0.0 }
 0x187   :  { %146 = vst.msk [vmem:[%s224_s5] sm:$0xff] %vm145_vm7, %v144_v35 }

</bundles_post_ra>
